<compile_context>
chip_gen: v7x
topology: tpu7x:2x2x1
jax: 0.10.0
libtpu: 0.0.40
codegen_flags: <defaults>
</compile_context>

<pallas_src>
import functools

import jax
import jax.numpy as jnp
from jax.experimental import pallas as pl
from jax.experimental.pallas import tpu as pltpu


def _patch_expand_kernel(x_ref, w_ref, b_ref, o_ref):
    # x_ref: (TL*W, C)      tokens of TL image rows of one batch element
    # w_ref: (2, C, C)      expand weight, LN gamma folded in, split per p1 (bf16)
    # b_ref: (2, 1, C)      beta @ W, split per p1 (f32)
    # o_ref: (TL, 2, W, C)  output pixels in (h, p1, w, (p2, c)) order
    tl, _, w_img, c = o_ref.shape

    x = x_ref[...].astype(jnp.float32)
    mean = jnp.mean(x, axis=-1, keepdims=True)
    xc = x - mean
    var = jnp.mean(xc * xc, axis=-1, keepdims=True)      # biased, like torch LN
    xn = (xc * jax.lax.rsqrt(var + 1e-5)).astype(jnp.bfloat16)

    # Two N=C matmuls (one per p1 half) on the MXU: bf16 operands, f32
    # accumulation.  Writing each half directly to its output image row avoids
    # lane-slicing a wide (TL*W, 2C) product when C is not a multiple of 128.
    for p1 in range(2):
        y = jnp.dot(xn, w_ref[p1], preferred_element_type=jnp.float32)
        y = y + b_ref[p1].astype(jnp.float32)             # folded beta @ W
        # The reshape only splits the sublane (token) dim; lanes are untouched.
        o_ref[:, p1, :, :] = y.reshape(tl, w_img, c).astype(o_ref.dtype)
    # TODO(synk): when C % 128 != 0 the output tile's last dim is lane-padded
    # (masked stores + short writeback rows); a sublane->lane repack to a
    # (TL, 2, W*C) tile would make the writeback fully lane-dense.


_TILE_VMEM_BUDGET = 28 * 1024 * 1024   # cap on estimated per-step VMEM footprint
_VMEM_LIMIT = 48 * 1024 * 1024         # <= ~48 MiB: headroom on v7x (64 MiB / TC)


def _round_up(x, m):
    return -(-x // m) * m


def _tile_vmem_bytes(tl, w, c, in_bytes, out_bytes):
    """Estimated VMEM footprint of one grid step (padding + all buffers)."""
    c_pad = _round_up(c, 128)                            # lane padding
    tlw = tl * w
    in_tile = _round_up(tlw, 32 // in_bytes) * c_pad * in_bytes
    out_tile = tl * 2 * _round_up(w, 32 // out_bytes) * c_pad * out_bytes
    wt_tile = 2 * _round_up(c, 16) * c_pad * 2           # (2, C, C) bf16 weight
    bias_tile = 2 * 8 * 128 * 4                          # (2, 1, C) f32, padded
    # Pallas double-buffers every input/output, including the constant-index
    # resident weight, so count 2x for all of them.
    pipelined = 2 * (in_tile + out_tile + wt_tile + bias_tile)
    temps = 3 * _round_up(tlw, 8) * c_pad * 4            # x, xn, y f32 live values
    return pipelined + temps


def _choose_row_tile(batch, h, w, c, in_bytes, out_bytes):
    """Pick TL (image rows per grid step)."""
    # Keep at least 2 grid programs so both of v7x's TensorCores get work.
    cap = h if batch >= 2 else max(1, h // 2)
    fit = 1
    for tl in range(1, cap + 1):                         # footprint is monotone in tl
        if _tile_vmem_bytes(tl, w, c, in_bytes, out_bytes) <= _TILE_VMEM_BUDGET:
            fit = tl
        else:
            break
    sub = 32 // in_bytes                                 # sublane pack of input dtype
    lo = max(1, fit // 2)
    # Prefer a tile that divides H and keeps the token count sublane-aligned,
    # but never shrink below half of the largest fitting tile: a slightly
    # ragged last block is legal and faster than a tiny tile.
    for tl in range(fit, lo - 1, -1):
        if h % tl == 0 and (tl * w) % sub == 0:
            return tl
    for tl in range(fit, lo - 1, -1):
        if (tl * w) % sub == 0:
            return tl
    return fit


@functools.partial(jax.jit, static_argnums=(4, 5))
def patch_expand(x, gamma, beta, w, input_resolution, out_dtype=jnp.bfloat16):
    """Pallas implementation of PatchExpand.forward.

    x:     (B, L, dim)   activations (L = H*W)
    gamma: (dim,)        LayerNorm weight
    beta:  (dim,)        LayerNorm bias
    w:     (dim, 2*dim)  expand weight, applied as x @ w (== torch x @ W.T)
    returns: (B, 4*L, dim // 2) in `out_dtype` (bf16 by default; the op is
             HBM-bandwidth bound and the output is ~2/3 of the bytes).
    """
    B, L, C = x.shape
    H, W = input_resolution
    if L != H * W:                       # module's resolution fallback
        new_res = int(L ** 0.5)
        assert new_res * new_res == L, "PatchExpand: L must be a perfect square"
        H, W = new_res, new_res
    c_out = C // 2

    # Fold the LayerNorm affine into the linear and pre-split per p1 half:
    #   (z*gamma + beta) @ w == z @ (gamma[:, None] * w) + beta @ w
    # Post-expand channels are ordered (p1, p2, c_out), so half 0 == w[:, :C].
    w_eff = (gamma[:, None] * w).astype(jnp.bfloat16)               # (C, 2C) bf16
    w_p1 = jnp.transpose(w_eff.reshape(C, 2, C), (1, 0, 2))         # (2, C, C)
    b_p1 = (beta @ w).astype(jnp.float32).reshape(2, 1, C)          # (2, 1, C)
    # TODO(synk): accept bf16 activations if the surrounding model emits them
    # (halves the remaining HBM read traffic); x.dtype is kept as provided.

    in_bytes = jnp.dtype(x.dtype).itemsize
    out_bytes = jnp.dtype(out_dtype).itemsize
    tl = _choose_row_tile(B, H, W, C, in_bytes, out_bytes)
    tlw = tl * W
    n_hblk = pl.cdiv(H, tl)

    out5 = pl.pallas_call(
        _patch_expand_kernel,
        out_shape=jax.ShapeDtypeStruct((B, H, 2, W, C), out_dtype),
        grid_spec=pltpu.PrefetchScalarGridSpec(
            num_scalar_prefetch=0,
            grid=(B, n_hblk),
            in_specs=[
                pl.BlockSpec((None, tlw, C), lambda b, h: (b, h, 0)),
                pl.BlockSpec((2, C, C), lambda b, h: (0, 0, 0)),   # resident weight
                pl.BlockSpec((2, 1, C), lambda b, h: (0, 0, 0)),   # resident bias
            ],
            out_specs=pl.BlockSpec((None, tl, 2, W, C),
                                   lambda b, h: (b, h, 0, 0, 0)),
        ),
        compiler_params=pltpu.CompilerParams(
            dimension_semantics=("parallel", "parallel"),
            vmem_limit_bytes=_VMEM_LIMIT),
    )(x, w_p1, b_p1)

    # (B, H, 2, W, C) row-major order == 'b (h p1) (w p2) c': free reshape.
    return out5.reshape(B, 4 * L, c_out)


def _reference(x, gamma, beta, w, input_resolution):
    """Pure-JAX f32 reference of the PyTorch forward (rearrange branch)."""
    mean = jnp.mean(x, axis=-1, keepdims=True)
    var = jnp.mean((x - mean) ** 2, axis=-1, keepdims=True)
    xn = (x - mean) / jnp.sqrt(var + 1e-5) * gamma + beta
    y = xn @ w
    B, L, C = y.shape
    H, W = input_resolution
    if L != H * W:
        r = int(L ** 0.5)
        H, W = r, r
    c_out = C // 4
    y = y.reshape(B, H, W, 2, 2, c_out)
    y = jnp.transpose(y, (0, 1, 3, 2, 4, 5))
    return y.reshape(B, 2 * H * 2 * W, c_out)


if __name__ == "__main__":
    def _check(B, H, W, dim, key):
        L = H * W
        kx, kg, kb, kw = jax.random.split(key, 4)
        x = jax.random.normal(kx, (B, L, dim), dtype=jnp.float32)
        gamma = 1.0 + 0.1 * jax.random.normal(kg, (dim,), dtype=jnp.float32)
        beta = 0.1 * jax.random.normal(kb, (dim,), dtype=jnp.float32)
        w = (jax.random.normal(kw, (dim, 2 * dim), dtype=jnp.float32)
             / jnp.sqrt(jnp.float32(dim)))

        out = jax.block_until_ready(
            patch_expand(x, gamma, beta, w, (H, W), jnp.bfloat16))
        assert out.shape == (B, 4 * L, dim // 2), out.shape
        assert out.dtype == jnp.bfloat16, out.dtype

        ref = _reference(x, gamma, beta, w, (H, W))
        # bf16 weights/activations into the MXU (f32 accumulation) + bf16
        # output, so compare against the all-f32 reference at bf16 tolerance.
        assert jnp.allclose(out.astype(jnp.float32), ref, atol=5e-2, rtol=5e-2), \
            f"mismatch vs reference (B={B}, H={H}, W={W}, dim={dim})"

    key = jax.random.PRNGKey(0)
    k1, k2 = jax.random.split(key)
    _check(B=2, H=8, W=8, dim=32, key=k1)    # small shape matching the module
    _check(B=1, H=16, W=16, dim=64, key=k2)  # B=1: exercises the two-core tile cap
    print("KERNEL_OK")
</pallas_src>

<mosaic_0001>
module attributes {stable_mosaic.version = 11 : i64} {
  func.func @_patch_expand_kernel(%arg0: i32, %arg1: i32, %arg2: memref<1x64x32xf32, #tpu.memory_space<vmem>>, %arg3: memref<2x32x32xbf16, #tpu.memory_space<vmem>>, %arg4: memref<2x1x32xf32, #tpu.memory_space<vmem>>, %arg5: memref<1x8x2x8x32xbf16, #tpu.memory_space<vmem>>) attributes {dimension_semantics = [#tpu.dimension_semantics<parallel>, #tpu.dimension_semantics<parallel>], iteration_bounds = array<i64: 2, 1>, scalar_prefetch = 0 : i64, scratch_operands = 0 : i64, tpu.core_type = #tpu.core_type<tc>, window_params = [{transform_indices = @transform_0, window_bounds = array<i64: 1, 64, 32>}, {pipeline_mode = #tpu.pipeline_mode<synchronous>, transform_indices = @transform_1, window_bounds = array<i64: 2, 32, 32>}, {pipeline_mode = #tpu.pipeline_mode<synchronous>, transform_indices = @transform_2, window_bounds = array<i64: 2, 1, 32>}, {transform_indices = @transform_3, window_bounds = array<i64: 1, 8, 2, 8, 32>}]} {
    %c0 = arith.constant 0 : index
    %c0_0 = arith.constant 0 : index
    %c0_1 = arith.constant 0 : index
    %0 = vector.load %arg2[%c0, %c0_0, %c0_1] : memref<1x64x32xf32, #tpu.memory_space<vmem>>, vector<1x64x32xf32>
    %1 = vector.shape_cast %0 : vector<1x64x32xf32> to vector<64x32xf32>
    %cst = arith.constant dense<0.000000e+00> : vector<64xf32>
    %2 = vector.multi_reduction <add>, %1, %cst [1] : vector<64x32xf32> to vector<64xf32>
    %3 = vector.shape_cast %2 : vector<64xf32> to vector<64x1xf32>
    %cst_2 = arith.constant 3.200000e+01 : f32
    %4 = vector.broadcast %cst_2 : f32 to vector<64x1xf32>
    %5 = arith.divf %3, %4 : vector<64x1xf32>
    %6 = vector.broadcast %5 : vector<64x1xf32> to vector<64x32xf32>
    %7 = arith.subf %1, %6 : vector<64x32xf32>
    %8 = arith.mulf %7, %7 : vector<64x32xf32>
    %cst_3 = arith.constant dense<0.000000e+00> : vector<64xf32>
    %9 = vector.multi_reduction <add>, %8, %cst_3 [1] : vector<64x32xf32> to vector<64xf32>
    %10 = vector.shape_cast %9 : vector<64xf32> to vector<64x1xf32>
    %cst_4 = arith.constant 3.200000e+01 : f32
    %11 = vector.broadcast %cst_4 : f32 to vector<64x1xf32>
    %12 = arith.divf %10, %11 : vector<64x1xf32>
    %cst_5 = arith.constant 9.99999974E-6 : f32
    %13 = vector.broadcast %cst_5 : f32 to vector<64x1xf32>
    %14 = arith.addf %12, %13 : vector<64x1xf32>
    %15 = math.rsqrt %14 : vector<64x1xf32>
    %16 = vector.broadcast %15 : vector<64x1xf32> to vector<64x32xf32>
    %17 = arith.mulf %7, %16 : vector<64x32xf32>
    %18 = arith.truncf %17 : vector<64x32xf32> to vector<64x32xbf16>
    %c0_6 = arith.constant 0 : index
    %c0_7 = arith.constant 0 : index
    %c0_8 = arith.constant 0 : index
    %19 = vector.load %arg3[%c0_6, %c0_7, %c0_8] : memref<2x32x32xbf16, #tpu.memory_space<vmem>>, vector<1x32x32xbf16>
    %20 = vector.shape_cast %19 : vector<1x32x32xbf16> to vector<32x32xbf16>
    %cst_9 = arith.constant dense<0.000000e+00> : vector<64x32xf32>
    %21 = tpu.matmul %18, %20, %cst_9 {dimension_numbers = #tpu.dot_dimension_numbers<[1], [0], [0], [1], [0, 0, 1, 1], [], []>} : vector<64x32xbf16>, vector<32x32xbf16>, vector<64x32xf32> -> vector<64x32xf32>
    %c0_10 = arith.constant 0 : index
    %c0_11 = arith.constant 0 : index
    %c0_12 = arith.constant 0 : index
    %22 = vector.load %arg4[%c0_10, %c0_11, %c0_12] : memref<2x1x32xf32, #tpu.memory_space<vmem>>, vector<1x1x32xf32>
    %23 = vector.shape_cast %22 : vector<1x1x32xf32> to vector<1x32xf32>
    %24 = vector.broadcast %23 : vector<1x32xf32> to vector<64x32xf32>
    %25 = arith.addf %21, %24 : vector<64x32xf32>
    %26 = vector.shape_cast %25 : vector<64x32xf32> to vector<8x8x32xf32>
    %27 = arith.truncf %26 : vector<8x8x32xf32> to vector<8x8x32xbf16>
    %c0_13 = arith.constant 0 : index
    %c0_14 = arith.constant 0 : index
    %c0_15 = arith.constant 0 : index
    %c0_16 = arith.constant 0 : index
    %c0_17 = arith.constant 0 : index
    %28 = vector.load %arg5[%c0_13, %c0_14, %c0_15, %c0_16, %c0_17] : memref<1x8x2x8x32xbf16, #tpu.memory_space<vmem>>, vector<1x8x1x8x32xbf16>
    %29 = vector.shape_cast %28 : vector<1x8x1x8x32xbf16> to vector<8x8x32xbf16>
    %30 = vector.shape_cast %27 : vector<8x8x32xbf16> to vector<1x8x1x8x32xbf16>
    tpu.vector_store %arg5[%c0_13, %c0_14, %c0_15, %c0_16, %c0_17], %30 {strides = array<i32>} : memref<1x8x2x8x32xbf16, #tpu.memory_space<vmem>>, vector<1x8x1x8x32xbf16>,
    %c1 = arith.constant 1 : index
    %c0_18 = arith.constant 0 : index
    %c0_19 = arith.constant 0 : index
    %31 = vector.load %arg3[%c1, %c0_18, %c0_19] : memref<2x32x32xbf16, #tpu.memory_space<vmem>>, vector<1x32x32xbf16>
    %32 = vector.shape_cast %31 : vector<1x32x32xbf16> to vector<32x32xbf16>
    %cst_20 = arith.constant dense<0.000000e+00> : vector<64x32xf32>
    %33 = tpu.matmul %18, %32, %cst_20 {dimension_numbers = #tpu.dot_dimension_numbers<[1], [0], [0], [1], [0, 0, 1, 1], [], []>} : vector<64x32xbf16>, vector<32x32xbf16>, vector<64x32xf32> -> vector<64x32xf32>
    %c1_21 = arith.constant 1 : index
    %c0_22 = arith.constant 0 : index
    %c0_23 = arith.constant 0 : index
    %34 = vector.load %arg4[%c1_21, %c0_22, %c0_23] : memref<2x1x32xf32, #tpu.memory_space<vmem>>, vector<1x1x32xf32>
    %35 = vector.shape_cast %34 : vector<1x1x32xf32> to vector<1x32xf32>
    %36 = vector.broadcast %35 : vector<1x32xf32> to vector<64x32xf32>
    %37 = arith.addf %33, %36 : vector<64x32xf32>
    %38 = vector.shape_cast %37 : vector<64x32xf32> to vector<8x8x32xf32>
    %39 = arith.truncf %38 : vector<8x8x32xf32> to vector<8x8x32xbf16>
    %c0_24 = arith.constant 0 : index
    %c0_25 = arith.constant 0 : index
    %c1_26 = arith.constant 1 : index
    %c0_27 = arith.constant 0 : index
    %c0_28 = arith.constant 0 : index
    %40 = vector.load %arg5[%c0_24, %c0_25, %c1_26, %c0_27, %c0_28] : memref<1x8x2x8x32xbf16, #tpu.memory_space<vmem>>, vector<1x8x1x8x32xbf16>
    %41 = vector.shape_cast %40 : vector<1x8x1x8x32xbf16> to vector<8x8x32xbf16>
    %42 = vector.shape_cast %39 : vector<8x8x32xbf16> to vector<1x8x1x8x32xbf16>
    tpu.vector_store %arg5[%c0_24, %c0_25, %c1_26, %c0_27, %c0_28], %42 {strides = array<i32>} : memref<1x8x2x8x32xbf16, #tpu.memory_space<vmem>>, vector<1x8x1x8x32xbf16>,
    return
  }
  func.func @transform_0(%arg0: i32, %arg1: i32) -> (i32, i32, i32) {
    %c0_i32 = arith.constant 0 : i32
    %c0_i32_0 = arith.constant 0 : i32
    return %arg0, %arg1, %c0_i32 : i32, i32, i32
  }
  func.func @transform_1(%arg0: i32, %arg1: i32) -> (i32, i32, i32) {
    %c0_i32 = arith.constant 0 : i32
    %c0_i32_0 = arith.constant 0 : i32
    %c0_i32_1 = arith.constant 0 : i32
    %c0_i32_2 = arith.constant 0 : i32
    return %c0_i32, %c0_i32_0, %c0_i32_1 : i32, i32, i32
  }
  func.func @transform_2(%arg0: i32, %arg1: i32) -> (i32, i32, i32) {
    %c0_i32 = arith.constant 0 : i32
    %c0_i32_0 = arith.constant 0 : i32
    %c0_i32_1 = arith.constant 0 : i32
    %c0_i32_2 = arith.constant 0 : i32
    return %c0_i32, %c0_i32_0, %c0_i32_1 : i32, i32, i32
  }
  func.func @transform_3(%arg0: i32, %arg1: i32) -> (i32, i32, i32, i32, i32) {
    %c0_i32 = arith.constant 0 : i32
    %c0_i32_0 = arith.constant 0 : i32
    %c0_i32_1 = arith.constant 0 : i32
    %c0_i32_2 = arith.constant 0 : i32
    return %arg0, %arg1, %c0_i32, %c0_i32_0, %c0_i32_1 : i32, i32, i32, i32, i32
  }
}

</mosaic_0001>

<bundles_post_ra>
// kernel: patch_expand.1
= control target key start
LH: loop header
LB: loop body
LE: loop exit
PB: predicated region body
PF: predicated region fallthrough
CT: control target
= control target key end

     0   :  { %s812_s12 = smov 0   ;;  %s814_s13 = smov 0   ;;  %s968_s0 = inlined_call_operand.vmem [shape: f32[2,64,32], index: 0, kind: input, shape index: {}]   ;;  %s969_s1 = inlined_call_operand.vmem [shape: bf16[2,32,32], index: 1, kind: input, shape index: {}]   ;;  %s970_s2 = inlined_call_operand.vmem [shape: f32[2,1,32], index: 2, kind: input, shape index: {}]   ;;  %s971_s3 = inlined_call_operand.vmem [shape: bf16[2,8,2,8,32], index: 3, kind: output, shape index: {}]  }
   0x1   :  { %s816_s14 = smov 0  }
   0x2 LB: > { %s25_s15 = sadd.s32 1, %s786_s13  ;;  %p652_p0 = scmp.ge.s32.totalorder %s790_s14, 1  ;;  %s790_s14 = sphi %s816_s14, %s13_s14   ;;  %s786_s13 = sphi %s814_s13, %s973_s13   ;;  %s782_s12 = sphi %s812_s12, %s972_s12  }
   0x3   : > { %p27_p1 = scmp.ge.s32.totalorder %s25_s15, 2  ;;  %p158_p2 = scmp.lt.s32.totalorder %s790_s14, 3 }
   0x5   : > { %s975_s15 = smov (%p27_p1, %s25_s15), 0  ;;  %p159_p3 = pnand %p652_p0, %p158_p2 }
   0x6   : > { %p192_p4 = scmp.lt.s32.totalorder (!%p159_p3), %s782_s12, 1  ;;  %vm221_vm0 = vcmask (!%p159_p3), 261120   ;;  %v748_v56 = vld [vmem:[%s969_s1] sm:$0xff] (!%p159_p3)   ;;  %v749_v57 = vld [vmem:[%s969_s1 + $0x10] sm:$0xff] (!%p159_p3)   ;;  %v750_v58 = vld [vmem:[%s969_s1 + $0x8] sm:$0xff] (!%p159_p3)   ;;  %vm439_vm1 = vcmask (!%p159_p3), 257024  }
   0x7   : > { %162 = sbr.rel (%p159_p3) target bundleno = 565 (0x235), region = 32  ;;  %700 = vmatprep.subr.bf16.mxu0 (!%p159_p3), %v748_v56  ;;  %712 = vmatprep.subr.bf16.mxu1 (!%p159_p3), %v749_v57  ;;  %v751_v59 = vld [vmem:[%s969_s1 + $0x18] sm:$0xff] (!%p159_p3)  }
   0x8   : > { %701 = vmatpush3.bf16.msra.mxu0 (!%p159_p3), %v748_v56  ;;  %713 = vmatpush3.bf16.msra.mxu1 (!%p159_p3), %v749_v57 }
   0x9   : > { %702 = vmatprep.subr.bf16.mxu0 (!%p159_p3), %v750_v58  ;;  %714 = vmatprep.subr.bf16.mxu1 (!%p159_p3), %v751_v59 }
   0xc   : > { %703 = vmatpush3.bf16.msra.mxu0 (!%p159_p3), %v750_v58  ;;  %715 = vmatpush3.bf16.msra.mxu1 (!%p159_p3), %v751_v59 }
   0xe   : > { %s977_s12 = smov (!%p192_p4, %s782_s12), 1 }
   0xf   : > { %s686_s16 = sshll.u32 %s977_s12, 6 }
  0x10   : > { %s199_s19 = scalar_lea.vmem %s968_s0, %s686_s16  ;;  %s925_s7 = scalar_lea.vmem %s971_s3, %s686_s16 }
  0x11   : > { %v213_v0 = vld [vmem:[%s199_s19] sm:$0xff]  ;;  %v215_v1 = vld [vmem:[%s199_s19 + $0x10] sm:$0xff]  ;;  %v214_v2 = vld [vmem:[%s199_s19 + $0x8] sm:$0xff] }
  0x12   : > { %v222_v3 = vsel %vm221_vm0, %v213_v0, 0.0  ;;  %v228_v4 = vsel %vm221_vm0, %v215_v1, 0.0  ;;  %v216_v5 = vld [vmem:[%s199_s19 + $0x18] sm:$0xff]  ;;  %v225_v6 = vsel %vm221_vm0, %v214_v2, 0.0  ;;  %v217_v8 = vld [vmem:[%s199_s19 + $0x20] sm:$0xff]  ;;  %v218_v9 = vld [vmem:[%s199_s19 + $0x28] sm:$0xff] }
  0x13   : > { %223 = vadd.xlane.f32.xlu0 %v222_v3  ;;  %229 = vadd.xlane.f32.xlu1 %v228_v4  ;;  %v231_v7 = vsel %vm221_vm0, %v216_v5, 0.0  ;;  %v234_v10 = vsel %vm221_vm0, %v217_v8, 0.0  ;;  %v237_v11 = vsel %vm221_vm0, %v218_v9, 0.0  ;;  %v219_v12 = vld [vmem:[%s199_s19 + $0x30] sm:$0xff]  ;;  %v220_v13 = vld [vmem:[%s199_s19 + $0x38] sm:$0xff] }
  0x14   : > { %v240_v14 = vsel %vm221_vm0, %v219_v12, 0.0  ;;  %v243_v15 = vsel %vm221_vm0, %v220_v13, 0.0 }
  0x17   : > { %226 = vadd.xlane.f32.xlu0 %v225_v6  ;;  %232 = vadd.xlane.f32.xlu1 %v231_v7 }
  0x1b   : > { %235 = vadd.xlane.f32.xlu0 %v234_v10  ;;  %238 = vadd.xlane.f32.xlu1 %v237_v11 }
  0x1f   : > { %241 = vadd.xlane.f32.xlu0 %v240_v14  ;;  %244 = vadd.xlane.f32.xlu1 %v243_v15 }
  0xa0   : > { %v224_v16 = vpop.xlane.xlu0 %223  ;;  %v230_v17 = vpop.xlane.xlu1 %229 }
  0xa1   : > { %v247_v18 = vmul.f32 0.03125, %v224_v16  ;;  %v249_v19 = vmul.f32 0.03125, %v230_v17 }
  0xa3   : > { %v846_v20 = vsub.f32 %v213_v0, %v247_v18  ;;  %v848_v21 = vsub.f32 %v215_v1, %v249_v19 }
  0xa4   : > { %v227_v22 = vpop.xlane.xlu0 %226  ;;  %v233_v23 = vpop.xlane.xlu1 %232 }
  0xa5   : > { %v248_v24 = vmul.f32 0.03125, %v227_v22  ;;  %v250_v25 = vmul.f32 0.03125, %v233_v23  ;;  %v263_v26 = vmul.f32 %v846_v20, %v846_v20  ;;  %v265_v27 = vmul.f32 %v848_v21, %v848_v21 }
  0xa7   : > { %v854_v28 = vsub.f32 %v214_v2, %v248_v24  ;;  %v856_v29 = vsub.f32 %v216_v5, %v250_v25  ;;  %v271_v30 = vsel %vm221_vm0, %v263_v26, 0.0  ;;  %v277_v33 = vsel %vm221_vm0, %v265_v27, 0.0 }
  0xa8   : > { %272 = vadd.xlane.f32.xlu0 %v271_v30  ;;  %v236_v31 = vpop.xlane.xlu0 %235  ;;  %v239_v32 = vpop.xlane.xlu1 %238 }
  0xa9   : > { %v251_v34 = vmul.f32 0.03125, %v236_v31  ;;  %v252_v35 = vmul.f32 0.03125, %v239_v32  ;;  %v264_v36 = vmul.f32 %v854_v28, %v854_v28  ;;  %v266_v37 = vmul.f32 %v856_v29, %v856_v29 }
  0xab   : > { %v864_v38 = vsub.f32 %v217_v8, %v251_v34  ;;  %v866_v39 = vsub.f32 %v218_v9, %v252_v35  ;;  %v274_v40 = vsel %vm221_vm0, %v264_v36, 0.0  ;;  %v280_v43 = vsel %vm221_vm0, %v266_v37, 0.0 }
  0xac   : > { %278 = vadd.xlane.f32.xlu0 %v277_v33  ;;  %275 = vadd.xlane.f32.xlu1 %v274_v40  ;;  %v242_v41 = vpop.xlane.xlu0 %241  ;;  %v245_v42 = vpop.xlane.xlu1 %244 }
  0xad   : > { %v253_v44 = vmul.f32 0.03125, %v242_v41  ;;  %v254_v45 = vmul.f32 0.03125, %v245_v42  ;;  %v267_v46 = vmul.f32 %v864_v38, %v864_v38  ;;  %v268_v47 = vmul.f32 %v866_v39, %v866_v39 }
  0xaf   : > { %v874_v48 = vsub.f32 %v219_v12, %v253_v44  ;;  %v876_v49 = vsub.f32 %v220_v13, %v254_v45  ;;  %v283_v50 = vsel %vm221_vm0, %v267_v46, 0.0  ;;  %v286_v51 = vsel %vm221_vm0, %v268_v47, 0.0 }
  0xb0   : > { %281 = vadd.xlane.f32.xlu1 %v280_v43  ;;  %284 = vadd.xlane.f32.xlu0 %v283_v50 }
  0xb1   : > { %v269_v52 = vmul.f32 %v874_v48, %v874_v48  ;;  %v270_v53 = vmul.f32 %v876_v49, %v876_v49 }
  0xb3   : > { %v289_v54 = vsel %vm221_vm0, %v269_v52, 0.0  ;;  %v292_v55 = vsel %vm221_vm0, %v270_v53, 0.0 }
  0xb4   : > { %287 = vadd.xlane.f32.xlu1 %v286_v51  ;;  %290 = vadd.xlane.f32.xlu0 %v289_v54 }
  0xb8   : > { %293 = vadd.xlane.f32.xlu1 %v292_v55 }
 0x135   : > { %v273_v60 = vpop.xlane.xlu0 %272 }
 0x136   : > { %v295_v61 = vmul.f32 0.03125, %v273_v60 }
 0x138   : > { %v303_v62 = vadd.f32 1e-05, %v295_v61 }
 0x139   : > { %v276_v63 = vpop.xlane.xlu1 %275  ;;  %v279_v0 = vpop.xlane.xlu0 %278 }
 0x13a   : > { %v296_v1 = vmul.f32 0.03125, %v276_v63  ;;  %v297_v2 = vmul.f32 0.03125, %v279_v0  ;;  %752 = vrsqrt.f32 %v303_v62 }
 0x13c   : > { %v304_v3 = vadd.f32 1e-05, %v296_v1  ;;  %v305_v4 = vadd.f32 1e-05, %v297_v2 }
 0x13d   : > { %v282_v5 = vpop.xlane.xlu1 %281  ;;  %v285_v6 = vpop.xlane.xlu0 %284 }
 0x13e   : > { %754 = vrsqrt.f32 %v304_v3  ;;  %v298_v7 = vmul.f32 0.03125, %v282_v5  ;;  %v299_v8 = vmul.f32 0.03125, %v285_v6 }
 0x13f   : > { %756 = vrsqrt.f32 %v305_v4 }
 0x140   : > { %v306_v9 = vadd.f32 1e-05, %v298_v7  ;;  %v307_v10 = vadd.f32 1e-05, %v299_v8 }
 0x141   : > { %v288_v11 = vpop.xlane.xlu1 %287  ;;  %v291_v12 = vpop.xlane.xlu0 %290 }
 0x142   : > { %758 = vrsqrt.f32 %v306_v9  ;;  %v300_v13 = vmul.f32 0.03125, %v288_v11  ;;  %v301_v14 = vmul.f32 0.03125, %v291_v12 }
 0x143   : > { %760 = vrsqrt.f32 %v307_v10 }
 0x144   : > { %v308_v15 = vadd.f32 1e-05, %v300_v13  ;;  %v309_v16 = vadd.f32 1e-05, %v301_v14  ;;  %v753_v18 = vpop.eup %752 }
 0x145   : > { %v294_v17 = vpop.xlane.xlu1 %293  ;;  %v319_v24 = vmul.f32 %v753_v18, %v846_v20 }
 0x146   : > { %762 = vrsqrt.f32 %v308_v15  ;;  %v302_v19 = vmul.f32 0.03125, %v294_v17 }
 0x147   : > { %764 = vrsqrt.f32 %v309_v16 }
 0x148   : > { %v755_v22 = vpop.eup %754  ;;  %v310_v23 = vadd.f32 1e-05, %v302_v19 }
 0x149   : > { %v320_v25 = vmul.f32 %v755_v22, %v854_v28  ;;  %v757_v26 = vpop.eup %756 }
 0x14a   : > { %766 = vrsqrt.f32 %v310_v23  ;;  %v321_v31 = vmul.f32 %v757_v26, %v848_v21 }
 0x14b   : > { %v327_v27 = vpack.c.bf16 %v320_v25, %v319_v24 }
 0x14c   : > { %v759_v30 = vpop.eup %758 }
 0x14d   : > { %704 = vmatprep.mubr.msk.bf16.mxu0 %vm221_vm0, %v327_v27  ;;  %716 = vmatprep.mubr.msk.bf16.mxu1 %vm221_vm0, %v327_v27  ;;  %v322_v32 = vmul.f32 %v759_v30, %v856_v29  ;;  %v761_v33 = vpop.eup %760 }
 0x14e   : > { %v323_v20 = vmul.f32 %v761_v33, %v864_v38  ;;  %v657_v38 = vld [vmem:[%s970_s2] ss:$0 sm:$0xff] }
 0x14f   : > { %v328_v34 = vpack.c.bf16 %v322_v32, %v321_v31 }
 0x150   : > { %v763_v35 = vpop.eup %762 }
 0x151   : > { %705 = vmatmul.mubr.msk.bf16.vlgmr.msra.gmra.mrb[0].mxu0 %vm221_vm0, %v328_v34  ;;  %717 = vmatmul.mubr.msk.bf16.vlgmr.msra.gmra.mrb[0].mxu1 %vm221_vm0, %v328_v34  ;;  %v324_v28 = vmul.f32 %v763_v35, %v866_v39  ;;  %v765_v36 = vpop.eup %764  ;;  %v669_v39 = vld [vmem:[%s970_s2 + $0x1] ss:$0 sm:$0xff] }
 0x152   : > { %v325_v21 = vmul.f32 %v765_v36, %v874_v48 }
 0x153   : > { %v329_v37 = vpack.c.bf16 %v324_v28, %v323_v20 }
 0x154   : > { %v767_v40 = vpop.eup %766 }
 0x155   : > { %708 = vmatprep.mubr.msk.bf16.mxu0 %vm221_vm0, %v329_v37  ;;  %720 = vmatprep.mubr.msk.bf16.mxu1 %vm221_vm0, %v329_v37  ;;  %v326_v29 = vmul.f32 %v767_v40, %v876_v49 }
 0x157   : > { %v330_v41 = vpack.c.bf16 %v326_v29, %v325_v21 }
 0x159   : > { %709 = vmatmul.mubr.msk.bf16.gmra.mrb[4].mxu0 %vm221_vm0, %v330_v41  ;;  %721 = vmatmul.mubr.msk.bf16.gmra.mrb[4].mxu1 %vm221_vm0, %v330_v41 }
 0x224   : > { %v706_v42 = vpop.f32.mrb[0].mxu0  ;;  %v718_v43 = vpop.f32.mrb[0].mxu1 }
 0x225   : > { %v409_v44 = vadd.f32 %v706_v42, %v657_v38  ;;  %v516_v45 = vadd.f32 %v718_v43, %v669_v39  ;;  %v400_v46 = vpop.f32.mrb[1].mxu0  ;;  %v507_v47 = vpop.f32.mrb[1].mxu1 }
 0x226   : > { %v401_v48 = vadd.f32 %v657_v38, %v400_v46  ;;  %v508_v49 = vadd.f32 %v669_v39, %v507_v47  ;;  %v707_v50 = vpop.f32.mrb[2].mxu0  ;;  %v719_v51 = vpop.f32.mrb[2].mxu1 }
 0x227   : > { %v433_v52 = vpack.c.bf16 %v409_v44, %v409_v44  ;;  %v540_v53 = vpack.c.bf16 %v516_v45, %v516_v45  ;;  %v412_v54 = vadd.f32 %v707_v50, %v657_v38  ;;  %v519_v55 = vadd.f32 %v719_v51, %v669_v39  ;;  %v403_v56 = vpop.f32.mrb[3].mxu0  ;;  %v510_v57 = vpop.f32.mrb[3].mxu1 }
 0x228   : > { %v431_v58 = vpack.c.bf16 %v401_v48, %v401_v48  ;;  %v538_v59 = vpack.c.bf16 %v508_v49, %v508_v49  ;;  %v404_v60 = vadd.f32 %v657_v38, %v403_v56  ;;  %v511_v61 = vadd.f32 %v669_v39, %v510_v57 }
 0x229   : > { %442 = vst.msk [vmem:[%s925_s7 + $0x10] sm:$0xf] %vm439_vm1, %v433_v52  ;;  %678 = vst.msk [vmem:[%s925_s7 + $0x14] sm:$0xf] %vm439_vm1, %v540_v53  ;;  %v434_v62 = vpack.c.bf16 %v412_v54, %v412_v54  ;;  %v541_v63 = vpack.c.bf16 %v519_v55, %v519_v55 }
 0x22a   : > { %440 = vst.msk [vmem:[%s925_s7] sm:$0xf] %vm439_vm1, %v431_v58  ;;  %676 = vst.msk [vmem:[%s925_s7 + $0x4] sm:$0xf] %vm439_vm1, %v538_v59  ;;  %v432_v0 = vpack.c.bf16 %v404_v60, %v404_v60  ;;  %v539_v1 = vpack.c.bf16 %v511_v61, %v511_v61 }
 0x22b   : > { %443 = vst.msk [vmem:[%s925_s7 + $0x18] sm:$0xf] %vm439_vm1, %v434_v62  ;;  %679 = vst.msk [vmem:[%s925_s7 + $0x1c] sm:$0xf] %vm439_vm1, %v541_v63 }
 0x22c   : > { %441 = vst.msk [vmem:[%s925_s7 + $0x8] sm:$0xf] %vm439_vm1, %v432_v0  ;;  %677 = vst.msk [vmem:[%s925_s7 + $0xc] sm:$0xf] %vm439_vm1, %v539_v1  ;;  %v710_v2 = vpop.f32.mrb[4].mxu0  ;;  %v722_v3 = vpop.f32.mrb[4].mxu1 }
 0x22d   : > { %v425_v4 = vadd.f32 %v710_v2, %v657_v38  ;;  %v532_v5 = vadd.f32 %v722_v3, %v669_v39  ;;  %v416_v6 = vpop.f32.mrb[5].mxu0  ;;  %v523_v7 = vpop.f32.mrb[5].mxu1 }
 0x22e   : > { %v417_v8 = vadd.f32 %v657_v38, %v416_v6  ;;  %v524_v9 = vadd.f32 %v669_v39, %v523_v7  ;;  %v711_v10 = vpop.f32.mrb[6].mxu0  ;;  %v723_v11 = vpop.f32.mrb[6].mxu1 }
 0x22f   : > { %v437_v12 = vpack.c.bf16 %v425_v4, %v425_v4  ;;  %v544_v13 = vpack.c.bf16 %v532_v5, %v532_v5  ;;  %v428_v14 = vadd.f32 %v711_v10, %v657_v38  ;;  %v535_v15 = vadd.f32 %v723_v11, %v669_v39  ;;  %v419_v16 = vpop.f32.mrb[7].mxu0  ;;  %v526_v17 = vpop.f32.mrb[7].mxu1 }
 0x230   : > { %v435_v18 = vpack.c.bf16 %v417_v8, %v417_v8  ;;  %v542_v19 = vpack.c.bf16 %v524_v9, %v524_v9  ;;  %v420_v22 = vadd.f32 %v657_v38, %v419_v16  ;;  %v527_v23 = vadd.f32 %v669_v39, %v526_v17 }
 0x231   : > { %446 = vst.msk [vmem:[%s925_s7 + $0x30] sm:$0xf] %vm439_vm1, %v437_v12  ;;  %682 = vst.msk [vmem:[%s925_s7 + $0x34] sm:$0xf] %vm439_vm1, %v544_v13  ;;  %v438_v24 = vpack.c.bf16 %v428_v14, %v428_v14  ;;  %v545_v25 = vpack.c.bf16 %v535_v15, %v535_v15 }
 0x232   : > { %444 = vst.msk [vmem:[%s925_s7 + $0x20] sm:$0xf] %vm439_vm1, %v435_v18  ;;  %680 = vst.msk [vmem:[%s925_s7 + $0x24] sm:$0xf] %vm439_vm1, %v542_v19  ;;  %v436_v26 = vpack.c.bf16 %v420_v22, %v420_v22  ;;  %v543_v27 = vpack.c.bf16 %v527_v23, %v527_v23 }
 0x233   : > { %447 = vst.msk [vmem:[%s925_s7 + $0x38] sm:$0xf] %vm439_vm1, %v438_v24  ;;  %683 = vst.msk [vmem:[%s925_s7 + $0x3c] sm:$0xf] %vm439_vm1, %v545_v25 }
 0x234   : > { %445 = vst.msk [vmem:[%s925_s7 + $0x28] sm:$0xf] %vm439_vm1, %v436_v26  ;;  %681 = vst.msk [vmem:[%s925_s7 + $0x2c] sm:$0xf] %vm439_vm1, %v543_v27 }
 0x235 PF: > { %s13_s14 = sadd.s32 1, %s790_s14   ;;  %s972_s12 = smov %s786_s13 }
 0x236   : > { %p10_p5 = scmp.ge.s32.totalorder %s13_s14, 4   ;;  %s973_s13 = smov %s975_s15 }
 0x238   :  { %12 = sbr.rel (!%p10_p5) target bundleno = 2 (0x2), region = 65 }

</bundles_post_ra>
